<compile_context>
chip_gen: v5e
topology: v5e:2x2
jax: 0.10.0
libtpu: 0.0.40
codegen_flags: <defaults>
</compile_context>

<pallas_src>
from functools import partial

import jax
import jax.numpy as jnp
from jax.experimental import pallas as pl
from jax.experimental.pallas import tpu as pltpu


# ---------------------------------------------------------------------------
# helpers
# ---------------------------------------------------------------------------
def _round_up(x, m):
    return ((x + m - 1) // m) * m


def _as_2d(x):
    """Mirror torch.squeeze for the intended (batch, ..., embed) layouts, but
    never squeeze away the batch or embedding axis (safe for batch == 1)."""
    if x.ndim > 2:
        squeeze_axes = tuple(ax for ax in range(1, x.ndim - 1) if x.shape[ax] == 1)
        if squeeze_axes:
            x = jnp.squeeze(x, axis=squeeze_axes)
    if x.ndim > 2:
        x = x.reshape(x.shape[0], -1)
    return x


# ---------------------------------------------------------------------------
# forward(): xui[b] = sum_d gum[b, d] * gim[b, d]
# Inputs arrive transposed as (D, TB): batch on lanes, embedding on sublanes.
# The reduction is a sublane reduce; the output block (1, TB) is lane-dense.
# ---------------------------------------------------------------------------
def _forward_kernel(gum_ref, gim_ref, out_ref):
    prod = gum_ref[...].astype(jnp.float32) * gim_ref[...].astype(jnp.float32)
    out_ref[...] = jnp.sum(prod, axis=0, keepdims=True).astype(out_ref.dtype)


@partial(jax.jit, static_argnames=("tile_b",))
def mmgcn_forward(gum, gim, *, tile_b=1024):
    """Replicates MMGCNModel.forward((gum, gim)) -> xui of shape [batch]."""
    gum = _as_2d(gum)
    gim = _as_2d(gim)
    assert gum.shape == gim.shape and gum.ndim == 2
    B, D = gum.shape
    out_dtype = gum.dtype

    # Batch goes onto the lane axis -> lane-dense output blocks.
    gum_t = gum.T                                   # (D, B)
    gim_t = gim.T                                   # (D, B)

    tb = min(_round_up(tile_b, 128), _round_up(B, 128))   # lane-aligned tile
    b_pad = _round_up(B, tb)
    if b_pad != B:
        pad = b_pad - B
        gum_t = jnp.pad(gum_t, ((0, 0), (0, pad)))        # zero pad: harmless
        gim_t = jnp.pad(gim_t, ((0, 0), (0, pad)))

    itemsize = jnp.dtype(gum.dtype).itemsize
    out = pl.pallas_call(
        _forward_kernel,
        out_shape=jax.ShapeDtypeStruct((1, b_pad), out_dtype),
        grid_spec=pl.GridSpec(
            grid=(b_pad // tb,),
            in_specs=[
                pl.BlockSpec((D, tb), lambda i: (0, i)),
                pl.BlockSpec((D, tb), lambda i: (0, i)),
            ],
            out_specs=pl.BlockSpec((1, tb), lambda i: (0, i)),
        ),
        compiler_params=pltpu.CompilerParams(
            dimension_semantics=("parallel",),
            vmem_limit_bytes=32 * 1024 * 1024,
        ),
        cost_estimate=pl.CostEstimate(
            flops=2 * b_pad * D,
            transcendentals=0,
            bytes_accessed=2 * b_pad * D * itemsize + b_pad * itemsize,
        ),
    )(gum_t, gim_t)
    return out[0, :B]                               # (B,) like torch.sum(..., 1)


# ---------------------------------------------------------------------------
# predict(): scores = gum @ gim.T, tiled over (users, items).
# RHS is pre-transposed to K-major (D, I) so the MXU consumes a standard
# [K, N] operand per tile without an XLU transpose.
# ---------------------------------------------------------------------------
def _predict_kernel(gu_ref, giT_ref, out_ref):
    out_ref[...] = jax.lax.dot_general(
        gu_ref[...], giT_ref[...],
        dimension_numbers=(((1,), (0,)), ((), ())),
        preferred_element_type=jnp.float32,
    ).astype(out_ref.dtype)


@partial(jax.jit, static_argnames=("tile_m", "tile_n", "compute_dtype"))
def mmgcn_predict(gum, gim, *, tile_m=512, tile_n=512, compute_dtype=None):
    """Replicates MMGCNModel.predict(gum, gim) -> f32 scores [num_users, num_items].

    compute_dtype=jnp.bfloat16 is the fast path on v5e/v6e/v7x MXUs if the
    accuracy budget allows; the accumulator / output stay f32 either way.
    """
    assert gum.ndim == 2 and gim.ndim == 2 and gum.shape[1] == gim.shape[1]
    U, D = gum.shape
    I = gim.shape[0]

    if compute_dtype is not None:
        gum = gum.astype(compute_dtype)
        gim = gim.astype(compute_dtype)
    gim_t = gim.T                                   # (D, I) K-major RHS

    tm = min(_round_up(tile_m, 8), _round_up(U, 8))       # sublane-aligned
    tn = min(_round_up(tile_n, 128), _round_up(I, 128))   # lane-aligned
    u_pad = _round_up(U, tm)
    i_pad = _round_up(I, tn)
    if u_pad != U:
        gum = jnp.pad(gum, ((0, u_pad - U), (0, 0)))
    if i_pad != I:
        gim_t = jnp.pad(gim_t, ((0, 0), (0, i_pad - I)))

    gm, gn = u_pad // tm, i_pad // tn
    itemsize = jnp.dtype(gum.dtype).itemsize
    # Each LHS row-panel is re-read per N tile, each RHS col-panel per M tile.
    bytes_accessed = (u_pad * D * gn + D * i_pad * gm) * itemsize + u_pad * i_pad * 4

    scores = pl.pallas_call(
        _predict_kernel,
        out_shape=jax.ShapeDtypeStruct((u_pad, i_pad), jnp.float32),
        grid_spec=pl.GridSpec(
            grid=(gm, gn),
            in_specs=[
                pl.BlockSpec((tm, D), lambda i, j: (i, 0)),
                pl.BlockSpec((D, tn), lambda i, j: (0, j)),
            ],
            out_specs=pl.BlockSpec((tm, tn), lambda i, j: (i, j)),
        ),
        compiler_params=pltpu.CompilerParams(
            dimension_semantics=("parallel", "parallel"),
            vmem_limit_bytes=32 * 1024 * 1024,      # headroom on v7x's 64 MiB
        ),
        cost_estimate=pl.CostEstimate(
            flops=2 * u_pad * i_pad * D,
            transcendentals=0,
            bytes_accessed=bytes_accessed,
        ),
    )(gum, gim_t)
    return scores[:U, :I]


# ---------------------------------------------------------------------------
# Deterministic parameter construction mirroring MMGCNModel.__init__ shapes.
# (forward() itself only consumes the propagated embeddings gum / gim.)
# ---------------------------------------------------------------------------
def xavier_normal(key, shape):
    fan_in, fan_out = shape[1], shape[0]
    std = (2.0 / (fan_in + fan_out)) ** 0.5
    return std * jax.random.normal(key, shape, dtype=jnp.float32)


def build_params(key, num_users, num_items, embed_k, mm_feat_shapes, modalities):
    keys = jax.random.split(key, 2 + 2 * len(modalities))
    params = {
        "Gu": xavier_normal(keys[0], (num_users, embed_k)),
        "Gi": xavier_normal(keys[1], (num_items, embed_k)),
        "Gum": {},
        "Gim": {},
    }
    for m_id, m in enumerate(modalities):
        params["Gum"][m] = xavier_normal(keys[2 + 2 * m_id],
                                         (num_users, mm_feat_shapes[m_id]))
        # Gim[m] is the raw multimodal item feature matrix in the module.
        params["Gim"][m] = jax.random.normal(keys[3 + 2 * m_id],
                                             (num_items, mm_feat_shapes[m_id]),
                                             dtype=jnp.float32)
    return params


if __name__ == "__main__":
    # Small, module-consistent shapes.
    num_users, num_items = 12, 20
    embed_k, embed_k_multimod = 16, 32
    modalities = ["visual", "textual"]
    mm_feat_shapes = [64, 48]
    batch = 8

    key = jax.random.PRNGKey(0)
    kp, kg_u, kg_i = jax.random.split(key, 3)

    # Module parameters (shapes as in __init__); not consumed by forward().
    params = build_params(kp, num_users, num_items, embed_k,
                          mm_feat_shapes, modalities)

    # Propagated multimodal embeddings fed to forward(): [batch, embed_k_multimod].
    gum_batch = jax.random.normal(kg_u, (batch, embed_k_multimod), dtype=jnp.float32)
    gim_batch = jax.random.normal(kg_i, (batch, embed_k_multimod), dtype=jnp.float32)

    xui = jax.block_until_ready(mmgcn_forward(gum_batch, gim_batch))

    # Reference check against plain JAX semantics of torch.sum(gu * gi, 1).
    ref = jnp.sum(gum_batch * gim_batch, axis=1)
    assert xui.shape == (batch,)
    assert jnp.allclose(xui, ref, atol=1e-5, rtol=1e-5)

    # Also exercise predict() path (gum @ gim.T) at full user/item scale.
    gum_all = jax.random.normal(jax.random.PRNGKey(1),
                                (num_users, embed_k_multimod), dtype=jnp.float32)
    gim_all = jax.random.normal(jax.random.PRNGKey(2),
                                (num_items, embed_k_multimod), dtype=jnp.float32)
    scores = jax.block_until_ready(mmgcn_predict(gum_all, gim_all))
    assert scores.shape == (num_users, num_items)
    assert jnp.allclose(scores, gum_all @ gim_all.T, atol=1e-4, rtol=1e-4)

    print("KERNEL_OK")
</pallas_src>

<mosaic_0001>
module attributes {stable_mosaic.version = 11 : i64} {
  func.func @_forward_kernel(%arg0: i32, %arg1: memref<32x128xf32, #tpu.memory_space<vmem>>, %arg2: memref<32x128xf32, #tpu.memory_space<vmem>>, %arg3: memref<1x128xf32, #tpu.memory_space<vmem>>) attributes {dimension_semantics = [#tpu.dimension_semantics<parallel>], iteration_bounds = array<i64: 1>, scalar_prefetch = 0 : i64, scratch_operands = 0 : i64, tpu.core_type = #tpu.core_type<tc>, window_params = [{transform_indices = @transform_0, window_bounds = array<i64: 32, 128>}, {transform_indices = @transform_1, window_bounds = array<i64: 32, 128>}, {transform_indices = @transform_2, window_bounds = array<i64: 1, 128>}]} {
    %c0 = arith.constant 0 : index
    %c0_0 = arith.constant 0 : index
    %0 = vector.load %arg1[%c0, %c0_0] : memref<32x128xf32, #tpu.memory_space<vmem>>, vector<32x128xf32>
    %c0_1 = arith.constant 0 : index
    %c0_2 = arith.constant 0 : index
    %1 = vector.load %arg2[%c0_1, %c0_2] : memref<32x128xf32, #tpu.memory_space<vmem>>, vector<32x128xf32>
    %2 = arith.mulf %0, %1 : vector<32x128xf32>
    %cst = arith.constant dense<0.000000e+00> : vector<128xf32>
    %3 = vector.multi_reduction <add>, %2, %cst [0] : vector<32x128xf32> to vector<128xf32>
    %4 = vector.shape_cast %3 : vector<128xf32> to vector<1x128xf32>
    %c0_3 = arith.constant 0 : index
    %c0_4 = arith.constant 0 : index
    %5 = vector.load %arg3[%c0_3, %c0_4] : memref<1x128xf32, #tpu.memory_space<vmem>>, vector<1x128xf32>
    tpu.vector_store %arg3[%c0_3, %c0_4], %4 {strides = array<i32>} : memref<1x128xf32, #tpu.memory_space<vmem>>, vector<1x128xf32>,
    return
  }
  func.func @transform_0(%arg0: i32) -> (i32, i32) {
    %c0_i32 = arith.constant 0 : i32
    %c0_i32_0 = arith.constant 0 : i32
    return %c0_i32, %arg0 : i32, i32
  }
  func.func @transform_1(%arg0: i32) -> (i32, i32) {
    %c0_i32 = arith.constant 0 : i32
    %c0_i32_0 = arith.constant 0 : i32
    return %c0_i32, %arg0 : i32, i32
  }
  func.func @transform_2(%arg0: i32) -> (i32, i32) {
    %c0_i32 = arith.constant 0 : i32
    %c0_i32_0 = arith.constant 0 : i32
    return %c0_i32, %arg0 : i32, i32
  }
}

</mosaic_0001>

<bundles_post_ra>
// kernel: mmgcn_forward.1
= control target key start
LH: loop header
LB: loop body
LE: loop exit
PB: predicated region body
PF: predicated region fallthrough
CT: control target
= control target key end

     0   :  { %s79_s0 = inlined_call_operand.vmem [shape: f32[32,128], index: 0, kind: input, shape index: {}]   ;;  %s80_s1 = inlined_call_operand.vmem [shape: f32[32,128], index: 1, kind: input, shape index: {}]   ;;  %s81_s2 = inlined_call_operand.vmem [shape: f32[1,128], index: 2, kind: output, shape index: {}]  }
   0x1   :  { %v11_v0 = vld [vmem:[%s79_s0] sm:$0xff]  ;;  %v12_v1 = vld [vmem:[%s79_s0 + $0x8] sm:$0xff]  ;;  %v13_v2 = vld [vmem:[%s79_s0 + $0x10] sm:$0xff] }
   0x2   :  { %v14_v3 = vld [vmem:[%s79_s0 + $0x18] sm:$0xff]  ;;  %v15_v4 = vld [vmem:[%s80_s1] sm:$0xff]  ;;  %v16_v5 = vld [vmem:[%s80_s1 + $0x8] sm:$0xff] }
   0x3   :  { %v17_v6 = vld [vmem:[%s80_s1 + $0x10] sm:$0xff]  ;;  %v18_v7 = vld [vmem:[%s80_s1 + $0x18] sm:$0xff]  ;;  %v19_v8 = vmul.f32 %v15_v4, %v11_v0  ;;  %v20_v9 = vmul.f32 %v16_v5, %v12_v1 }
   0x4   :  { %v21_v10 = vmul.f32 %v17_v6, %v13_v2  ;;  %v22_v11 = vmul.f32 %v18_v7, %v14_v3 }
   0x5   :  { %v23_v12 = vadd.f32 %v20_v9, %v19_v8 }
   0x7   :  { %v24_v13 = vadd.f32 %v23_v12, %v21_v10 }
   0x9   :  { %v25_v14 = vadd.f32 %v24_v13, %v22_v11 }
   0xb   :  { %v26_v15 = vrot.slane %v25_v14, 4 }
   0xd   :  { %v27_v16 = vadd.f32 %v26_v15, %v25_v14 }
   0xf   :  { %v28_v17 = vrot.slane %v27_v16, 2 }
  0x11   :  { %v29_v18 = vadd.f32 %v28_v17, %v27_v16 }
  0x13   :  { %v30_v19 = vrot.slane %v29_v18, 1 }
  0x15   :  { %v31_v20 = vadd.f32 %v30_v19, %v29_v18 }
  0x17   :  { %32 = vst [vmem:[%s81_s2] sm:$0x1] %v31_v20 }

</bundles_post_ra>
